<compile_context>
chip_gen: v7x
topology: tpu7x:2x2x1
jax: 0.10.0
libtpu: 0.0.40
codegen_flags: <defaults>
</compile_context>

<pallas_src>
import functools

import jax
import jax.numpy as jnp
from jax.experimental import pallas as pl
from jax.experimental.pallas import tpu as pltpu


def _resblock_kernel(x_ref, w0_ref, b0_ref, w1_ref, b1_ref, out_ref,
                     zbuf_ref, patch_ref, *, c, k, h, w):
    """One batch element per grid step.

    x_ref     : (1, C, H*W)        VMEM  input image, lane-flattened
    w0_ref    : (C, K*K*C)         VMEM  conv0 weights, columns = (kh, kw, ci)
    b0_ref    : (C, 1)             VMEM
    w1_ref    : (C, K*K*C)         VMEM  conv1 weights
    b1_ref    : (C, 1)             VMEM
    out_ref   : (1, C, H*W)        VMEM
    zbuf_ref  : (C, H*W + 2*PADL)  VMEM scratch: zero-padded flattened plane
    patch_ref : (K*K*C, H*W)       VMEM scratch: im2col patch matrix
    """
    hw = h * w
    pad = (k - 1) // 2
    padl = pad * (w + 1)   # covers the most extreme tap shift |dh*W + dw|

    # Zero the padded plane; the pad lanes implement the top/bottom rows of
    # 'SAME' zero padding for every tap (they are never overwritten below).
    zbuf_ref[...] = jnp.zeros_like(zbuf_ref)

    # Column masks for the left/right image boundary (computed once, reused
    # by both convolutions and all taps / output channels).
    col = jax.lax.broadcasted_iota(jnp.int32, (1, hw), 1) % w
    col_mask = {dw: (col + dw >= 0) & (col + dw < w)
                for dw in range(-pad, pad + 1) if dw != 0}

    def fill_patches(src):
        """patch_ref[(kh*K+kw)*C + ci, p] = src[ci] shifted by (kh-pad, kw-pad)
        with zero fill outside the HxW image ('SAME' semantics)."""
        zbuf_ref[:, padl:padl + hw] = src
        for kh in range(k):
            for kw in range(k):
                dh, dw = kh - pad, kw - pad
                s = dh * w + dw
                win = zbuf_ref[:, padl + s:padl + s + hw]        # (C, H*W)
                if dw != 0:
                    win = jnp.where(col_mask[dw], win, 0.0)
                t = kh * k + kw
                patch_ref[t * c:(t + 1) * c, :] = win

    x = x_ref[0, :, :]                                           # (C, H*W)

    # ---- conv0 + bias0 + ReLU: one MXU matmul over all K*K*C taps ----------
    fill_patches(x)
    y0 = jnp.dot(w0_ref[...], patch_ref[...],
                 preferred_element_type=jnp.float32) + b0_ref[...]
    y0 = jnp.maximum(y0, 0.0)                                    # (C, H*W)

    # ---- conv1 + bias1 + residual + final ReLU (zero halo around y0) -------
    fill_patches(y0)
    y1 = jnp.dot(w1_ref[...], patch_ref[...],
                 preferred_element_type=jnp.float32) + b1_ref[...]
    out_ref[0, :, :] = jnp.maximum(x + y1, 0.0)


def resblock_forward(x, w0, b0, w1, b1):
    """x: (N, C, H, W) f32; w*: (C_out, C_in, K, K); b*: (C_out,)."""
    n, c, h, w = x.shape
    c_out, c_in, k, _ = w0.shape
    assert c == c_in and c_out == c_in, "residual add requires c_in == c_out"
    assert k % 2 == 1, "'same' padding assumes odd kernel size"
    hw = h * w
    pad = (k - 1) // 2
    padl = pad * (w + 1)

    # Lane-dense views + weight matrices (tiny reshapes, no HBM spatial pad).
    x_flat = x.reshape(n, c, hw)
    w0_mat = jnp.transpose(w0, (0, 2, 3, 1)).reshape(c_out, k * k * c_in)
    w1_mat = jnp.transpose(w1, (0, 2, 3, 1)).reshape(c_out, k * k * c_out)
    b0_col = b0.reshape(c_out, 1)
    b1_col = b1.reshape(c_out, 1)

    kernel = functools.partial(_resblock_kernel, c=c, k=k, h=h, w=w)

    out_flat = pl.pallas_call(
        kernel,
        out_shape=jax.ShapeDtypeStruct((n, c_out, hw), jnp.float32),
        grid=(n,),
        in_specs=[
            pl.BlockSpec((1, c, hw), lambda i: (i, 0, 0)),
            pl.BlockSpec((c_out, k * k * c_in), lambda i: (0, 0)),
            pl.BlockSpec((c_out, 1), lambda i: (0, 0)),
            pl.BlockSpec((c_out, k * k * c_out), lambda i: (0, 0)),
            pl.BlockSpec((c_out, 1), lambda i: (0, 0)),
        ],
        out_specs=pl.BlockSpec((1, c_out, hw), lambda i: (i, 0, 0)),
        scratch_shapes=[
            pltpu.VMEM((c, hw + 2 * padl), jnp.float32),   # zero-padded plane
            pltpu.VMEM((k * k * c, hw), jnp.float32),      # im2col patches
        ],
        compiler_params=pltpu.CompilerParams(
            dimension_semantics=("parallel",)),
    )(x_flat, w0_mat, b0_col, w1_mat, b1_col)
    return out_flat.reshape(n, c_out, h, w)


def _ref_resblock(x, w0, b0, w1, b1):
    """Pure-JAX reference matching the PyTorch module semantics."""
    dn = ('NCHW', 'OIHW', 'NCHW')
    y = jax.lax.conv_general_dilated(x, w0, (1, 1), 'SAME',
                                     dimension_numbers=dn)
    y = jnp.maximum(y + b0[None, :, None, None], 0.0)
    y = jax.lax.conv_general_dilated(y, w1, (1, 1), 'SAME',
                                     dimension_numbers=dn)
    y = y + b1[None, :, None, None]
    return jnp.maximum(x + y, 0.0)


if __name__ == "__main__":
    # ResBlock(c_in=4, c_out=4, conv_size=3); input NCHW = (2, 4, 16, 16)
    N, C, H, W, K = 2, 4, 16, 16, 3

    key = jax.random.PRNGKey(0)
    kx, k0w, k0b, k1w, k1b = jax.random.split(key, 5)

    x = jax.random.normal(kx, (N, C, H, W), dtype=jnp.float32)

    fan_in = C * K * K
    scale = 1.0 / jnp.sqrt(jnp.float32(fan_in))
    w0 = jax.random.uniform(k0w, (C, C, K, K), jnp.float32, -scale, scale)
    b0 = jax.random.uniform(k0b, (C,), jnp.float32, -scale, scale)
    w1 = jax.random.uniform(k1w, (C, C, K, K), jnp.float32, -scale, scale)
    b1 = jax.random.uniform(k1b, (C,), jnp.float32, -scale, scale)

    out = jax.jit(resblock_forward)(x, w0, b0, w1, b1)
    out = jax.block_until_ready(out)

    ref = _ref_resblock(x, w0, b0, w1, b1)
    assert out.shape == (N, C, H, W)
    assert jnp.allclose(out, ref, atol=1e-4, rtol=1e-4), "mismatch vs reference"

    print("KERNEL_OK")
</pallas_src>

<mosaic_0001>
module attributes {stable_mosaic.version = 11 : i64} {
  func.func @_resblock_kernel(%arg0: i32, %arg1: memref<1x4x256xf32, #tpu.memory_space<vmem>>, %arg2: memref<4x36xf32, #tpu.memory_space<vmem>>, %arg3: memref<4x1xf32, #tpu.memory_space<vmem>>, %arg4: memref<4x36xf32, #tpu.memory_space<vmem>>, %arg5: memref<4x1xf32, #tpu.memory_space<vmem>>, %arg6: memref<1x4x256xf32, #tpu.memory_space<vmem>>, %arg7: memref<4x290xf32, #tpu.memory_space<vmem>>, %arg8: memref<36x256xf32, #tpu.memory_space<vmem>>) attributes {dimension_semantics = [#tpu.dimension_semantics<parallel>], iteration_bounds = array<i64: 2>, scalar_prefetch = 0 : i64, scratch_operands = 2 : i64, tpu.core_type = #tpu.core_type<tc>, window_params = [{transform_indices = @transform_0, window_bounds = array<i64: 1, 4, 256>}, {pipeline_mode = #tpu.pipeline_mode<synchronous>, transform_indices = @transform_1, window_bounds = array<i64: 4, 36>}, {pipeline_mode = #tpu.pipeline_mode<synchronous>, transform_indices = @transform_2, window_bounds = array<i64: 4, 1>}, {pipeline_mode = #tpu.pipeline_mode<synchronous>, transform_indices = @transform_3, window_bounds = array<i64: 4, 36>}, {pipeline_mode = #tpu.pipeline_mode<synchronous>, transform_indices = @transform_4, window_bounds = array<i64: 4, 1>}, {transform_indices = @transform_5, window_bounds = array<i64: 1, 4, 256>}]} {
    %cst = arith.constant 0.000000e+00 : f32
    %0 = vector.broadcast %cst : f32 to vector<4x290xf32>
    %c0 = arith.constant 0 : index
    %c0_0 = arith.constant 0 : index
    %1 = vector.load %arg7[%c0, %c0_0] : memref<4x290xf32, #tpu.memory_space<vmem>>, vector<4x290xf32>
    tpu.vector_store %arg7[%c0, %c0_0], %0 {strides = array<i32>} : memref<4x290xf32, #tpu.memory_space<vmem>>, vector<4x290xf32>,
    %2 = tpu.iota {dimensions = array<i32: 1>} : vector<1x256xi32>
    %c16_i32 = arith.constant 16 : i32
    %c0_i32 = arith.constant 0 : i32
    %3 = arith.cmpi eq, %c16_i32, %c0_i32 : i32
    %c1_i32 = arith.constant 1 : i32
    %4 = arith.select %3, %c1_i32, %c16_i32 : i32
    %5 = vector.broadcast %4 : i32 to vector<1x256xi32>
    %6 = arith.remsi %2, %5 : vector<1x256xi32>
    %c0_i32_1 = arith.constant 0 : i32
    %7 = vector.broadcast %c0_i32_1 : i32 to vector<1x256xi32>
    %8 = arith.cmpi ne, %6, %7 : vector<1x256xi32>
    %c0_i32_2 = arith.constant 0 : i32
    %9 = vector.broadcast %c0_i32_2 : i32 to vector<1x256xi32>
    %10 = arith.cmpi slt, %6, %9 : vector<1x256xi32>
    %c0_i32_3 = arith.constant 0 : i32
    %11 = arith.cmpi slt, %4, %c0_i32_3 : i32
    %12 = vector.broadcast %11 : i1 to vector<1x256xi1>
    %13 = vector.broadcast %12 : vector<1x256xi1> to vector<1x256xi1>
    %14 = arith.xori %10, %13 : vector<1x256xi1>
    %15 = arith.andi %14, %8 : vector<1x256xi1>
    %16 = vector.broadcast %4 : i32 to vector<1x256xi32>
    %17 = arith.addi %6, %16 : vector<1x256xi32>
    %18 = arith.select %15, %17, %6 : vector<1x256xi1>, vector<1x256xi32>
    %c-1_i32 = arith.constant -1 : i32
    %19 = vector.broadcast %c-1_i32 : i32 to vector<1x256xi32>
    %20 = arith.addi %18, %19 : vector<1x256xi32>
    %c0_i32_4 = arith.constant 0 : i32
    %21 = vector.broadcast %c0_i32_4 : i32 to vector<1x256xi32>
    %22 = arith.cmpi sge, %20, %21 : vector<1x256xi32>
    %c-1_i32_5 = arith.constant -1 : i32
    %23 = vector.broadcast %c-1_i32_5 : i32 to vector<1x256xi32>
    %24 = arith.addi %18, %23 : vector<1x256xi32>
    %c16_i32_6 = arith.constant 16 : i32
    %25 = vector.broadcast %c16_i32_6 : i32 to vector<1x256xi32>
    %26 = arith.cmpi slt, %24, %25 : vector<1x256xi32>
    %27 = arith.andi %22, %26 : vector<1x256xi1>
    %c1_i32_7 = arith.constant 1 : i32
    %28 = vector.broadcast %c1_i32_7 : i32 to vector<1x256xi32>
    %29 = arith.addi %18, %28 : vector<1x256xi32>
    %c0_i32_8 = arith.constant 0 : i32
    %30 = vector.broadcast %c0_i32_8 : i32 to vector<1x256xi32>
    %31 = arith.cmpi sge, %29, %30 : vector<1x256xi32>
    %c1_i32_9 = arith.constant 1 : i32
    %32 = vector.broadcast %c1_i32_9 : i32 to vector<1x256xi32>
    %33 = arith.addi %18, %32 : vector<1x256xi32>
    %c16_i32_10 = arith.constant 16 : i32
    %34 = vector.broadcast %c16_i32_10 : i32 to vector<1x256xi32>
    %35 = arith.cmpi slt, %33, %34 : vector<1x256xi32>
    %36 = arith.andi %31, %35 : vector<1x256xi1>
    %c0_11 = arith.constant 0 : index
    %c0_12 = arith.constant 0 : index
    %c0_13 = arith.constant 0 : index
    %37 = vector.load %arg1[%c0_11, %c0_12, %c0_13] : memref<1x4x256xf32, #tpu.memory_space<vmem>>, vector<1x4x256xf32>
    %38 = vector.shape_cast %37 : vector<1x4x256xf32> to vector<4x256xf32>
    %c0_14 = arith.constant 0 : index
    %c17 = arith.constant 17 : index
    %39 = vector.load %arg7[%c0_14, %c17] : memref<4x290xf32, #tpu.memory_space<vmem>>, vector<4x256xf32>
    tpu.vector_store %arg7[%c0_14, %c17], %38 {strides = array<i32>} : memref<4x290xf32, #tpu.memory_space<vmem>>, vector<4x256xf32>,
    %c0_15 = arith.constant 0 : index
    %c0_16 = arith.constant 0 : index
    %40 = vector.load %arg7[%c0_15, %c0_16] : memref<4x290xf32, #tpu.memory_space<vmem>>, vector<4x256xf32>
    %cst_17 = arith.constant 0.000000e+00 : f32
    %41 = vector.shape_cast %27 : vector<1x256xi1> to vector<1x256xi1>
    %42 = vector.broadcast %41 : vector<1x256xi1> to vector<4x256xi1>
    %43 = vector.broadcast %cst_17 : f32 to vector<4x256xf32>
    %44 = arith.select %42, %40, %43 : vector<4x256xi1>, vector<4x256xf32>
    %c0_18 = arith.constant 0 : index
    %c0_19 = arith.constant 0 : index
    %45 = vector.load %arg8[%c0_18, %c0_19] : memref<36x256xf32, #tpu.memory_space<vmem>>, vector<4x256xf32>
    tpu.vector_store %arg8[%c0_18, %c0_19], %44 {strides = array<i32>} : memref<36x256xf32, #tpu.memory_space<vmem>>, vector<4x256xf32>,
    %c0_20 = arith.constant 0 : index
    %c1 = arith.constant 1 : index
    %46 = vector.load %arg7[%c0_20, %c1] : memref<4x290xf32, #tpu.memory_space<vmem>>, vector<4x256xf32>
    %c4 = arith.constant 4 : index
    %c0_21 = arith.constant 0 : index
    %47 = vector.load %arg8[%c4, %c0_21] : memref<36x256xf32, #tpu.memory_space<vmem>>, vector<4x256xf32>
    tpu.vector_store %arg8[%c4, %c0_21], %46 {strides = array<i32>} : memref<36x256xf32, #tpu.memory_space<vmem>>, vector<4x256xf32>,
    %c0_22 = arith.constant 0 : index
    %c2 = arith.constant 2 : index
    %48 = vector.load %arg7[%c0_22, %c2] : memref<4x290xf32, #tpu.memory_space<vmem>>, vector<4x256xf32>
    %cst_23 = arith.constant 0.000000e+00 : f32
    %49 = vector.shape_cast %36 : vector<1x256xi1> to vector<1x256xi1>
    %50 = vector.broadcast %49 : vector<1x256xi1> to vector<4x256xi1>
    %51 = vector.broadcast %cst_23 : f32 to vector<4x256xf32>
    %52 = arith.select %50, %48, %51 : vector<4x256xi1>, vector<4x256xf32>
    %c8 = arith.constant 8 : index
    %c0_24 = arith.constant 0 : index
    %53 = vector.load %arg8[%c8, %c0_24] : memref<36x256xf32, #tpu.memory_space<vmem>>, vector<4x256xf32>
    tpu.vector_store %arg8[%c8, %c0_24], %52 {strides = array<i32>} : memref<36x256xf32, #tpu.memory_space<vmem>>, vector<4x256xf32>,
    %c0_25 = arith.constant 0 : index
    %c16 = arith.constant 16 : index
    %54 = vector.load %arg7[%c0_25, %c16] : memref<4x290xf32, #tpu.memory_space<vmem>>, vector<4x256xf32>
    %cst_26 = arith.constant 0.000000e+00 : f32
    %55 = vector.shape_cast %27 : vector<1x256xi1> to vector<1x256xi1>
    %56 = vector.broadcast %55 : vector<1x256xi1> to vector<4x256xi1>
    %57 = vector.broadcast %cst_26 : f32 to vector<4x256xf32>
    %58 = arith.select %56, %54, %57 : vector<4x256xi1>, vector<4x256xf32>
    %c12 = arith.constant 12 : index
    %c0_27 = arith.constant 0 : index
    %59 = vector.load %arg8[%c12, %c0_27] : memref<36x256xf32, #tpu.memory_space<vmem>>, vector<4x256xf32>
    tpu.vector_store %arg8[%c12, %c0_27], %58 {strides = array<i32>} : memref<36x256xf32, #tpu.memory_space<vmem>>, vector<4x256xf32>,
    %c0_28 = arith.constant 0 : index
    %c17_29 = arith.constant 17 : index
    %60 = vector.load %arg7[%c0_28, %c17_29] : memref<4x290xf32, #tpu.memory_space<vmem>>, vector<4x256xf32>
    %c16_30 = arith.constant 16 : index
    %c0_31 = arith.constant 0 : index
    %61 = vector.load %arg8[%c16_30, %c0_31] : memref<36x256xf32, #tpu.memory_space<vmem>>, vector<4x256xf32>
    tpu.vector_store %arg8[%c16_30, %c0_31], %60 {strides = array<i32>} : memref<36x256xf32, #tpu.memory_space<vmem>>, vector<4x256xf32>,
    %c0_32 = arith.constant 0 : index
    %c18 = arith.constant 18 : index
    %62 = vector.load %arg7[%c0_32, %c18] : memref<4x290xf32, #tpu.memory_space<vmem>>, vector<4x256xf32>
    %cst_33 = arith.constant 0.000000e+00 : f32
    %63 = vector.shape_cast %36 : vector<1x256xi1> to vector<1x256xi1>
    %64 = vector.broadcast %63 : vector<1x256xi1> to vector<4x256xi1>
    %65 = vector.broadcast %cst_33 : f32 to vector<4x256xf32>
    %66 = arith.select %64, %62, %65 : vector<4x256xi1>, vector<4x256xf32>
    %c20 = arith.constant 20 : index
    %c0_34 = arith.constant 0 : index
    %67 = vector.load %arg8[%c20, %c0_34] : memref<36x256xf32, #tpu.memory_space<vmem>>, vector<4x256xf32>
    tpu.vector_store %arg8[%c20, %c0_34], %66 {strides = array<i32>} : memref<36x256xf32, #tpu.memory_space<vmem>>, vector<4x256xf32>,
    %c0_35 = arith.constant 0 : index
    %c32 = arith.constant 32 : index
    %68 = vector.load %arg7[%c0_35, %c32] : memref<4x290xf32, #tpu.memory_space<vmem>>, vector<4x256xf32>
    %cst_36 = arith.constant 0.000000e+00 : f32
    %69 = vector.shape_cast %27 : vector<1x256xi1> to vector<1x256xi1>
    %70 = vector.broadcast %69 : vector<1x256xi1> to vector<4x256xi1>
    %71 = vector.broadcast %cst_36 : f32 to vector<4x256xf32>
    %72 = arith.select %70, %68, %71 : vector<4x256xi1>, vector<4x256xf32>
    %c24 = arith.constant 24 : index
    %c0_37 = arith.constant 0 : index
    %73 = vector.load %arg8[%c24, %c0_37] : memref<36x256xf32, #tpu.memory_space<vmem>>, vector<4x256xf32>
    tpu.vector_store %arg8[%c24, %c0_37], %72 {strides = array<i32>} : memref<36x256xf32, #tpu.memory_space<vmem>>, vector<4x256xf32>,
    %c0_38 = arith.constant 0 : index
    %c33 = arith.constant 33 : index
    %74 = vector.load %arg7[%c0_38, %c33] : memref<4x290xf32, #tpu.memory_space<vmem>>, vector<4x256xf32>
    %c28 = arith.constant 28 : index
    %c0_39 = arith.constant 0 : index
    %75 = vector.load %arg8[%c28, %c0_39] : memref<36x256xf32, #tpu.memory_space<vmem>>, vector<4x256xf32>
    tpu.vector_store %arg8[%c28, %c0_39], %74 {strides = array<i32>} : memref<36x256xf32, #tpu.memory_space<vmem>>, vector<4x256xf32>,
    %c0_40 = arith.constant 0 : index
    %c34 = arith.constant 34 : index
    %76 = vector.load %arg7[%c0_40, %c34] : memref<4x290xf32, #tpu.memory_space<vmem>>, vector<4x256xf32>
    %cst_41 = arith.constant 0.000000e+00 : f32
    %77 = vector.shape_cast %36 : vector<1x256xi1> to vector<1x256xi1>
    %78 = vector.broadcast %77 : vector<1x256xi1> to vector<4x256xi1>
    %79 = vector.broadcast %cst_41 : f32 to vector<4x256xf32>
    %80 = arith.select %78, %76, %79 : vector<4x256xi1>, vector<4x256xf32>
    %c32_42 = arith.constant 32 : index
    %c0_43 = arith.constant 0 : index
    %81 = vector.load %arg8[%c32_42, %c0_43] : memref<36x256xf32, #tpu.memory_space<vmem>>, vector<4x256xf32>
    tpu.vector_store %arg8[%c32_42, %c0_43], %80 {strides = array<i32>} : memref<36x256xf32, #tpu.memory_space<vmem>>, vector<4x256xf32>,
    %c0_44 = arith.constant 0 : index
    %c0_45 = arith.constant 0 : index
    %82 = vector.load %arg2[%c0_44, %c0_45] : memref<4x36xf32, #tpu.memory_space<vmem>>, vector<4x36xf32>
    %c0_46 = arith.constant 0 : index
    %c0_47 = arith.constant 0 : index
    %83 = vector.load %arg8[%c0_46, %c0_47] : memref<36x256xf32, #tpu.memory_space<vmem>>, vector<36x256xf32>
    %cst_48 = arith.constant dense<0.000000e+00> : vector<4x256xf32>
    %84 = tpu.matmul %82, %83, %cst_48 {dimension_numbers = #tpu.dot_dimension_numbers<[1], [0], [0], [1], [0, 0, 1, 1], [], []>} : vector<4x36xf32>, vector<36x256xf32>, vector<4x256xf32> -> vector<4x256xf32>
    %c0_49 = arith.constant 0 : index
    %c0_50 = arith.constant 0 : index
    %85 = vector.load %arg3[%c0_49, %c0_50] : memref<4x1xf32, #tpu.memory_space<vmem>>, vector<4x1xf32>
    %86 = vector.broadcast %85 : vector<4x1xf32> to vector<4x256xf32>
    %87 = arith.addf %84, %86 : vector<4x256xf32>
    %cst_51 = arith.constant 0.000000e+00 : f32
    %88 = vector.broadcast %cst_51 : f32 to vector<4x256xf32>
    %89 = arith.maximumf %87, %88 : vector<4x256xf32>
    %c0_52 = arith.constant 0 : index
    %c17_53 = arith.constant 17 : index
    %90 = vector.load %arg7[%c0_52, %c17_53] : memref<4x290xf32, #tpu.memory_space<vmem>>, vector<4x256xf32>
    tpu.vector_store %arg7[%c0_52, %c17_53], %89 {strides = array<i32>} : memref<4x290xf32, #tpu.memory_space<vmem>>, vector<4x256xf32>,
    %c0_54 = arith.constant 0 : index
    %c0_55 = arith.constant 0 : index
    %91 = vector.load %arg7[%c0_54, %c0_55] : memref<4x290xf32, #tpu.memory_space<vmem>>, vector<4x256xf32>
    %cst_56 = arith.constant 0.000000e+00 : f32
    %92 = vector.shape_cast %27 : vector<1x256xi1> to vector<1x256xi1>
    %93 = vector.broadcast %92 : vector<1x256xi1> to vector<4x256xi1>
    %94 = vector.broadcast %cst_56 : f32 to vector<4x256xf32>
    %95 = arith.select %93, %91, %94 : vector<4x256xi1>, vector<4x256xf32>
    %c0_57 = arith.constant 0 : index
    %c0_58 = arith.constant 0 : index
    %96 = vector.load %arg8[%c0_57, %c0_58] : memref<36x256xf32, #tpu.memory_space<vmem>>, vector<4x256xf32>
    tpu.vector_store %arg8[%c0_57, %c0_58], %95 {strides = array<i32>} : memref<36x256xf32, #tpu.memory_space<vmem>>, vector<4x256xf32>,
    %c0_59 = arith.constant 0 : index
    %c1_60 = arith.constant 1 : index
    %97 = vector.load %arg7[%c0_59, %c1_60] : memref<4x290xf32, #tpu.memory_space<vmem>>, vector<4x256xf32>
    %c4_61 = arith.constant 4 : index
    %c0_62 = arith.constant 0 : index
    %98 = vector.load %arg8[%c4_61, %c0_62] : memref<36x256xf32, #tpu.memory_space<vmem>>, vector<4x256xf32>
    tpu.vector_store %arg8[%c4_61, %c0_62], %97 {strides = array<i32>} : memref<36x256xf32, #tpu.memory_space<vmem>>, vector<4x256xf32>,
    %c0_63 = arith.constant 0 : index
    %c2_64 = arith.constant 2 : index
    %99 = vector.load %arg7[%c0_63, %c2_64] : memref<4x290xf32, #tpu.memory_space<vmem>>, vector<4x256xf32>
    %cst_65 = arith.constant 0.000000e+00 : f32
    %100 = vector.shape_cast %36 : vector<1x256xi1> to vector<1x256xi1>
    %101 = vector.broadcast %100 : vector<1x256xi1> to vector<4x256xi1>
    %102 = vector.broadcast %cst_65 : f32 to vector<4x256xf32>
    %103 = arith.select %101, %99, %102 : vector<4x256xi1>, vector<4x256xf32>
    %c8_66 = arith.constant 8 : index
    %c0_67 = arith.constant 0 : index
    %104 = vector.load %arg8[%c8_66, %c0_67] : memref<36x256xf32, #tpu.memory_space<vmem>>, vector<4x256xf32>
    tpu.vector_store %arg8[%c8_66, %c0_67], %103 {strides = array<i32>} : memref<36x256xf32, #tpu.memory_space<vmem>>, vector<4x256xf32>,
    %c0_68 = arith.constant 0 : index
    %c16_69 = arith.constant 16 : index
    %105 = vector.load %arg7[%c0_68, %c16_69] : memref<4x290xf32, #tpu.memory_space<vmem>>, vector<4x256xf32>
    %cst_70 = arith.constant 0.000000e+00 : f32
    %106 = vector.shape_cast %27 : vector<1x256xi1> to vector<1x256xi1>
    %107 = vector.broadcast %106 : vector<1x256xi1> to vector<4x256xi1>
    %108 = vector.broadcast %cst_70 : f32 to vector<4x256xf32>
    %109 = arith.select %107, %105, %108 : vector<4x256xi1>, vector<4x256xf32>
    %c12_71 = arith.constant 12 : index
    %c0_72 = arith.constant 0 : index
    %110 = vector.load %arg8[%c12_71, %c0_72] : memref<36x256xf32, #tpu.memory_space<vmem>>, vector<4x256xf32>
    tpu.vector_store %arg8[%c12_71, %c0_72], %109 {strides = array<i32>} : memref<36x256xf32, #tpu.memory_space<vmem>>, vector<4x256xf32>,
    %c0_73 = arith.constant 0 : index
    %c17_74 = arith.constant 17 : index
    %111 = vector.load %arg7[%c0_73, %c17_74] : memref<4x290xf32, #tpu.memory_space<vmem>>, vector<4x256xf32>
    %c16_75 = arith.constant 16 : index
    %c0_76 = arith.constant 0 : index
    %112 = vector.load %arg8[%c16_75, %c0_76] : memref<36x256xf32, #tpu.memory_space<vmem>>, vector<4x256xf32>
    tpu.vector_store %arg8[%c16_75, %c0_76], %111 {strides = array<i32>} : memref<36x256xf32, #tpu.memory_space<vmem>>, vector<4x256xf32>,
    %c0_77 = arith.constant 0 : index
    %c18_78 = arith.constant 18 : index
    %113 = vector.load %arg7[%c0_77, %c18_78] : memref<4x290xf32, #tpu.memory_space<vmem>>, vector<4x256xf32>
    %cst_79 = arith.constant 0.000000e+00 : f32
    %114 = vector.shape_cast %36 : vector<1x256xi1> to vector<1x256xi1>
    %115 = vector.broadcast %114 : vector<1x256xi1> to vector<4x256xi1>
    %116 = vector.broadcast %cst_79 : f32 to vector<4x256xf32>
    %117 = arith.select %115, %113, %116 : vector<4x256xi1>, vector<4x256xf32>
    %c20_80 = arith.constant 20 : index
    %c0_81 = arith.constant 0 : index
    %118 = vector.load %arg8[%c20_80, %c0_81] : memref<36x256xf32, #tpu.memory_space<vmem>>, vector<4x256xf32>
    tpu.vector_store %arg8[%c20_80, %c0_81], %117 {strides = array<i32>} : memref<36x256xf32, #tpu.memory_space<vmem>>, vector<4x256xf32>,
    %c0_82 = arith.constant 0 : index
    %c32_83 = arith.constant 32 : index
    %119 = vector.load %arg7[%c0_82, %c32_83] : memref<4x290xf32, #tpu.memory_space<vmem>>, vector<4x256xf32>
    %cst_84 = arith.constant 0.000000e+00 : f32
    %120 = vector.shape_cast %27 : vector<1x256xi1> to vector<1x256xi1>
    %121 = vector.broadcast %120 : vector<1x256xi1> to vector<4x256xi1>
    %122 = vector.broadcast %cst_84 : f32 to vector<4x256xf32>
    %123 = arith.select %121, %119, %122 : vector<4x256xi1>, vector<4x256xf32>
    %c24_85 = arith.constant 24 : index
    %c0_86 = arith.constant 0 : index
    %124 = vector.load %arg8[%c24_85, %c0_86] : memref<36x256xf32, #tpu.memory_space<vmem>>, vector<4x256xf32>
    tpu.vector_store %arg8[%c24_85, %c0_86], %123 {strides = array<i32>} : memref<36x256xf32, #tpu.memory_space<vmem>>, vector<4x256xf32>,
    %c0_87 = arith.constant 0 : index
    %c33_88 = arith.constant 33 : index
    %125 = vector.load %arg7[%c0_87, %c33_88] : memref<4x290xf32, #tpu.memory_space<vmem>>, vector<4x256xf32>
    %c28_89 = arith.constant 28 : index
    %c0_90 = arith.constant 0 : index
    %126 = vector.load %arg8[%c28_89, %c0_90] : memref<36x256xf32, #tpu.memory_space<vmem>>, vector<4x256xf32>
    tpu.vector_store %arg8[%c28_89, %c0_90], %125 {strides = array<i32>} : memref<36x256xf32, #tpu.memory_space<vmem>>, vector<4x256xf32>,
    %c0_91 = arith.constant 0 : index
    %c34_92 = arith.constant 34 : index
    %127 = vector.load %arg7[%c0_91, %c34_92] : memref<4x290xf32, #tpu.memory_space<vmem>>, vector<4x256xf32>
    %cst_93 = arith.constant 0.000000e+00 : f32
    %128 = vector.shape_cast %36 : vector<1x256xi1> to vector<1x256xi1>
    %129 = vector.broadcast %128 : vector<1x256xi1> to vector<4x256xi1>
    %130 = vector.broadcast %cst_93 : f32 to vector<4x256xf32>
    %131 = arith.select %129, %127, %130 : vector<4x256xi1>, vector<4x256xf32>
    %c32_94 = arith.constant 32 : index
    %c0_95 = arith.constant 0 : index
    %132 = vector.load %arg8[%c32_94, %c0_95] : memref<36x256xf32, #tpu.memory_space<vmem>>, vector<4x256xf32>
    tpu.vector_store %arg8[%c32_94, %c0_95], %131 {strides = array<i32>} : memref<36x256xf32, #tpu.memory_space<vmem>>, vector<4x256xf32>,
    %c0_96 = arith.constant 0 : index
    %c0_97 = arith.constant 0 : index
    %133 = vector.load %arg4[%c0_96, %c0_97] : memref<4x36xf32, #tpu.memory_space<vmem>>, vector<4x36xf32>
    %c0_98 = arith.constant 0 : index
    %c0_99 = arith.constant 0 : index
    %134 = vector.load %arg8[%c0_98, %c0_99] : memref<36x256xf32, #tpu.memory_space<vmem>>, vector<36x256xf32>
    %cst_100 = arith.constant dense<0.000000e+00> : vector<4x256xf32>
    %135 = tpu.matmul %133, %134, %cst_100 {dimension_numbers = #tpu.dot_dimension_numbers<[1], [0], [0], [1], [0, 0, 1, 1], [], []>} : vector<4x36xf32>, vector<36x256xf32>, vector<4x256xf32> -> vector<4x256xf32>
    %c0_101 = arith.constant 0 : index
    %c0_102 = arith.constant 0 : index
    %136 = vector.load %arg5[%c0_101, %c0_102] : memref<4x1xf32, #tpu.memory_space<vmem>>, vector<4x1xf32>
    %137 = vector.broadcast %136 : vector<4x1xf32> to vector<4x256xf32>
    %138 = arith.addf %135, %137 : vector<4x256xf32>
    %139 = arith.addf %38, %138 : vector<4x256xf32>
    %cst_103 = arith.constant 0.000000e+00 : f32
    %140 = vector.broadcast %cst_103 : f32 to vector<4x256xf32>
    %141 = arith.maximumf %139, %140 : vector<4x256xf32>
    %c0_104 = arith.constant 0 : index
    %c0_105 = arith.constant 0 : index
    %c0_106 = arith.constant 0 : index
    %142 = vector.load %arg6[%c0_104, %c0_105, %c0_106] : memref<1x4x256xf32, #tpu.memory_space<vmem>>, vector<1x4x256xf32>
    %143 = vector.shape_cast %142 : vector<1x4x256xf32> to vector<4x256xf32>
    %144 = vector.shape_cast %141 : vector<4x256xf32> to vector<1x4x256xf32>
    tpu.vector_store %arg6[%c0_104, %c0_105, %c0_106], %144 {strides = array<i32>} : memref<1x4x256xf32, #tpu.memory_space<vmem>>, vector<1x4x256xf32>,
    return
  }
  func.func @transform_0(%arg0: i32) -> (i32, i32, i32) {
    %c0_i32 = arith.constant 0 : i32
    %c0_i32_0 = arith.constant 0 : i32
    %c0_i32_1 = arith.constant 0 : i32
    return %arg0, %c0_i32, %c0_i32_0 : i32, i32, i32
  }
  func.func @transform_1(%arg0: i32) -> (i32, i32) {
    %c0_i32 = arith.constant 0 : i32
    %c0_i32_0 = arith.constant 0 : i32
    %c0_i32_1 = arith.constant 0 : i32
    return %c0_i32, %c0_i32_0 : i32, i32
  }
  func.func @transform_2(%arg0: i32) -> (i32, i32) {
    %c0_i32 = arith.constant 0 : i32
    %c0_i32_0 = arith.constant 0 : i32
    %c0_i32_1 = arith.constant 0 : i32
    return %c0_i32, %c0_i32_0 : i32, i32
  }
  func.func @transform_3(%arg0: i32) -> (i32, i32) {
    %c0_i32 = arith.constant 0 : i32
    %c0_i32_0 = arith.constant 0 : i32
    %c0_i32_1 = arith.constant 0 : i32
    return %c0_i32, %c0_i32_0 : i32, i32
  }
  func.func @transform_4(%arg0: i32) -> (i32, i32) {
    %c0_i32 = arith.constant 0 : i32
    %c0_i32_0 = arith.constant 0 : i32
    %c0_i32_1 = arith.constant 0 : i32
    return %c0_i32, %c0_i32_0 : i32, i32
  }
  func.func @transform_5(%arg0: i32) -> (i32, i32, i32) {
    %c0_i32 = arith.constant 0 : i32
    %c0_i32_0 = arith.constant 0 : i32
    %c0_i32_1 = arith.constant 0 : i32
    return %arg0, %c0_i32, %c0_i32_0 : i32, i32, i32
  }
}

</mosaic_0001>

<bundles_post_ra>
// kernel: resblock_forward.1
= control target key start
LH: loop header
LB: loop body
LE: loop exit
PB: predicated region body
PF: predicated region fallthrough
CT: control target
= control target key end

     0   :  { %s1022_s18 = smov 0   ;;  %s1244_s0 = inlined_call_operand.vmem [shape: f32[2,4,256], index: 0, kind: input, shape index: {}]   ;;  %s1245_s1 = inlined_call_operand.vmem [shape: f32[4,36], index: 1, kind: input, shape index: {}]   ;;  %s1246_s2 = inlined_call_operand.vmem [shape: f32[4,1], index: 2, kind: input, shape index: {}]   ;;  %s1247_s3 = inlined_call_operand.vmem [shape: f32[4,36], index: 3, kind: input, shape index: {}]   ;;  %s1248_s4 = inlined_call_operand.vmem [shape: f32[4,1], index: 4, kind: input, shape index: {}]   ;;  %s1249_s5 = inlined_call_operand.vmem [shape: f32[2,4,256], index: 5, kind: output, shape index: {}]  }
   0x1 LB: > { %s909_s19 = sadd.s32 4294967295, %s979_s18   ;;  %p913_p0 = scmp.ge.s32.totalorder %s979_s18, 1  ;;  %s979_s18 = sphi %s1022_s18, %s15_s18  }
   0x2   : > { %p187_p1 = scmp.lt.s32.totalorder %s979_s18, 3 }
   0x4   : > { %p188_p2 = pnand %p913_p0, %p187_p1 }
   0x5   : > { %p215_p3 = scmp.lt.s32.totalorder (!%p188_p2), %s909_s19, 1  ;;  %vm226_vm0 = vcmask (!%p188_p2), 273408   ;;  %v981_v0 = vmov (!%p188_p2), 0.0   ;;  %s982_s24 = smov (!%p188_p2), 17   ;;  %v228_v2 = vlaneseq (!%p188_p2)  ;;  %vm280_vm1 = vcmask (!%p188_p2), 1043592  }
   0x6   : > { %191 = sbr.rel (%p188_p2) target bundleno = 1052 (0x41c), region = 40  ;;  %225 = vst [vmem:[#allocation2] sm:$0xff] (!%p188_p2), %v981_v0  ;;  %227 = vst.msk [vmem:[#allocation2 + $0x8] sm:$0xf] (!%p188_p2), %vm226_vm0, %v981_v0  ;;  %562 = vmatprep.mubr.f32.mxu0 (!%p188_p2), %v981_v0  ;;  %840 = vmatprep.mubr.f32.mxu1 (!%p188_p2), %v981_v0  ;;  %vm281_vm2 = vcmask (!%p188_p2), 1047556   ;;  %vm276_vm3 = vcmask (!%p188_p2), 138240  }
   0x7   : > { %v1042_v3 = vand.u32 (!%p188_p2), 127, %v228_v2  ;;  %vm284_vm4 = vcmask (!%p188_p2), 134144   ;;  %vm1047_vm5 = vmor (!%p188_p2), %vm281_vm2, %vm280_vm1  ;;  %s983_s25 = smov (!%p188_p2), 96   ;;  %s984_s26 = smov (!%p188_p2), 112   ;;  %v991_v26 = vmov (!%p188_p2), 0   ;;  %vm310_vm8 = vcmask (!%p188_p2), 1039360  }
   0x8   : > { %s985_s27 = smov (!%p188_p2), 111   ;;  %s986_s28 = smov (!%p188_p2), 126   ;;  %963 = vset.pattern.permute.xlu1 (!%p188_p2), %v991_v26  ;;  %v481_v27 = vld [vmem:[%s1246_s2] sm:$0xf] (!%p188_p2)  ;;  %964 = vset.pattern.permute.xlu0 (!%p188_p2), %v991_v26  ;;  %vm443_vm9 = vcmask (!%p188_p2), 777216   ;;  %vm352_vm10 = vcmask (!%p188_p2), 916480  }
   0x9   : > { %v1045_v4 = vadd.s32 (!%p188_p2), 128, %v1042_v3  ;;  %v235_v8 = vand.u32 (!%p188_p2), 15, %v1042_v3  ;;  %s987_s29 = smov (!%p188_p2), 110   ;;  %s988_s30 = smov (!%p188_p2), 127   ;;  %vm332_vm11 = vcmask (!%p188_p2), 1031168   ;;  %vm396_vm14 = vcmask (!%p188_p2), 900096  }
   0xa   : > { %s989_s6 = smov (!%p188_p2), 95   ;;  %s990_s7 = smov (!%p188_p2), 94   ;;  %vm422_vm15 = vcmask (!%p188_p2), 785408   ;;  %vm378_vm0 = vcmask (!%p188_p2), 908288   ;;  %vm1250_vm1 = vcmask (!%p188_p2), 769024   ;;  %vm491_vm2 = vcmask (!%p188_p2), 1043456  }
   0xb   : > { %v242_v10 = vand.u32 (!%p188_p2), 15, %v1045_v4  ;;  %v1059_v11 = vadd.s32 (!%p188_p2), 4294967295, %v235_v8  ;;  %v1105_v41 = vadd.s32 (!%p188_p2), 1, %v235_v8 }
   0xd   : > { %s1256_s19 = smov (!%p215_p3, %s909_s19), 1  ;;  %v1063_v12 = vadd.s32 4294967295, %v242_v10  ;;  %vm257_vm6 = vcmp.ge.s32.totalorder %v1059_v11, 0  ;;  %v1109_v42 = vadd.s32 1, %v242_v10  ;;  %vm267_vm12 = vcmp.lt.s32.totalorder %v1105_v41, 16 }
   0xe   : > { %s926_s20 = sshll.u32 %s1256_s19, 3 }
   0xf   : > { %s219_s23 = scalar_lea.vmem %s1244_s0, %s926_s20  ;;  %vm258_vm7 = vcmp.ge.s32.totalorder %v1063_v12, 0  ;;  %vm268_vm13 = vcmp.lt.s32.totalorder %v1109_v42, 16  ;;  %s224_s21 = scalar_lea.vmem %s1249_s5, %s926_s20 }
  0x10   : > { %v1038_v1 = vld [vmem:[%s219_s23] sm:$0xff] }
  0x11   : > { %273 = vrot.lane.b32.xlu0 %v1038_v1, %s982_s24 }
  0x83   : > { %v274_v5 = vpop.permute.xlu0 %273 }
  0x84   : > { %v275_v7 = vrot.slane %v274_v5, 4 }
  0x86   : > { %v277_v9 = vsel %vm276_vm3, %v275_v7, %v274_v5  ;;  %285 = vst.msk [vmem:[#allocation2 + $0x8] sm:$0xf] %vm284_vm4, %v275_v7 }
  0x87   : > { %283 = vst.msk [vmem:[#allocation2] sm:$0xff] %vm1047_vm5, %v277_v9 }
  0x8d   : > { %v412_v13 = vld [vmem:[#allocation2 + $0x8] sm:$0xf] }
  0x8e   : > { %v342_v14 = vld [vmem:[#allocation2 + $0x8] sm:$0xf]  ;;  %420 = vrot.lane.b32.xlu0 %v412_v13, %s983_s25  ;;  %v298_v15 = vld [vmem:[#allocation2] sm:$0xff] }
  0x8f   : > { %350 = vrot.lane.b32.xlu1 %v342_v14, %s984_s26  ;;  %v345_v16 = vcombine.high %v298_v15, %v298_v15  ;;  %v294_v17 = vsel %vm257_vm6, %v298_v15, 0.0  ;;  %v368_v18 = vld [vmem:[#allocation2 + $0x8] sm:$0xf]  ;;  %v302_v24 = vcombine.low %v298_v15, %v298_v15 }
  0x90   : > { %v318_v19 = vld [vmem:[#allocation2 + $0x8] sm:$0xf]  ;;  %296 = vst [vmem:[#allocation3] sm:$0xf] %v294_v17 }
  0x91   : > { %v295_v20 = vsel %vm258_vm7, %v345_v16, 0.0  ;;  %v386_v21 = vld [vmem:[#allocation2 + $0x8] sm:$0xf] }
  0x92   : > { %376 = vrot.lane.b32.xlu0 %v368_v18, %s985_s27  ;;  %297 = vst [vmem:[#allocation3 + $0x8] sm:$0xf] %v295_v20  ;;  %v965_v22 = vld [vmem:[#allocation2 + $0x8] ss:$0 sps:$4 sm:$0xff]  }
  0x93   : > { %330 = vrot.lane.b32.xlu1 %v318_v19, %s986_s28  ;;  %v966_v23 = vld [vmem:[#allocation2 + $0x8] ss:$0 sps:$4 sm:$0xff]  }
  0x94   : > { %v451_v25 = vld [vmem:[#allocation2 + $0x8] sm:$0xf] }
  0x96   : > { %306 = vrot.lane.b32.xlu0 %v298_v15, %s988_s30 }
  0x97   : > { %394 = vrot.lane.b32.xlu1 %v386_v21, %s987_s29 }
  0x9a   : > { %326 = vrot.lane.b32.xlu0 %v298_v15, %s986_s28 }
  0x9b   : > { %346 = vrot.lane.b32.xlu1 %v298_v15, %s984_s26 }
  0x9e   : > { %390 = vrot.lane.b32.xlu0 %v298_v15, %s987_s29 }
  0x9f   : > { %416 = vrot.lane.b32.xlu1 %v298_v15, %s983_s25 }
  0xa2   : > { %439 = vrot.lane.b32.xlu0 %v298_v15, %s989_s6 }
  0xa3   : > { %308 = vrot.lane.b32.xlu1 %v965_v22, %s988_s30 }
  0xa6   : > { %348 = vrot.lane.b32.xlu0 %v345_v16, %s984_s26 }
  0xa7   : > { %441 = vrot.lane.b32.xlu1 %v966_v23, %s989_s6 }
  0xaa   : > { %328 = vrot.lane.b32.xlu0 %v345_v16, %s986_s28 }
  0xab   : > { %304 = vrot.lane.b32.xlu1 %v302_v24, %s988_s30 }
  0xae   : > { %392 = vrot.lane.b32.xlu0 %v345_v16, %s987_s29 }
  0xaf   : > { %418 = vrot.lane.b32.xlu1 %v345_v16, %s983_s25 }
  0xb2   : > { %372 = vrot.lane.b32.xlu0 %v298_v15, %s985_s27 }
  0xb3   : > { %374 = vrot.lane.b32.xlu1 %v345_v16, %s985_s27 }
  0xb6   : > { %457 = vrot.lane.b32.xlu0 %v345_v16, %s990_s7 }
  0xb7   : > { %437 = vrot.lane.b32.xlu1 %v302_v24, %s989_s6 }
  0xba   : > { %455 = vrot.lane.b32.xlu0 %v298_v15, %s990_s7 }
  0xbb   : > { %459 = vrot.lane.b32.xlu1 %v451_v25, %s990_s7 }
  0xbf   : > { %484 = vperm.xlu1 %963, %v481_v27  }
 0x100   : > { %v421_v28 = vpop.permute.xlu0 %420 }
 0x101   : > { %v351_v29 = vpop.permute.xlu1 %350 }
 0x104   : > { %v1098_v30 = vpop.permute.xlu0 %376 }
 0x105   : > { %v331_v31 = vpop.permute.xlu1 %330 }
 0x108   : > { %v307_v33 = vpop.permute.xlu0 %306 }
 0x109   : > { %v395_v32 = vpop.permute.xlu1 %394 }
 0x10c   : > { %v327_v35 = vpop.permute.xlu0 %326 }
 0x10d   : > { %v347_v34 = vpop.permute.xlu1 %346 }
 0x110   : > { %v391_v37 = vpop.permute.xlu0 %390 }
 0x111   : > { %v417_v36 = vpop.permute.xlu1 %416 }
 0x114   : > { %v1100_v39 = vpop.permute.xlu0 %439 }
 0x115   : > { %v309_v38 = vpop.permute.xlu1 %308 }
 0x116   : > { %v312_v40 = vsel %vm310_vm8, %v307_v33, %v309_v38 }
 0x117   : > { %316 = vst [vmem:[#allocation3 + $0x8] sm:$0xf0] %v312_v40 }
 0x118   : > { %v349_v44 = vpop.permute.xlu0 %348 }
 0x119   : > { %v442_v43 = vpop.permute.xlu1 %441  ;;  %v353_v46 = vsel %vm352_vm10, %v347_v34, %v349_v44  ;;  %v354_v47 = vsel %vm352_vm10, %v349_v44, %v351_v29 }
 0x11a   : > { %v445_v45 = vsel %vm443_vm9, %v1100_v39, %v442_v43  ;;  %v357_v48 = vsel %vm257_vm6, %v353_v46, 0.0  ;;  %v358_v49 = vsel %vm258_vm7, %v354_v47, 0.0 }
 0x11b   : > { %449 = vst [vmem:[#allocation3 + $0x38] sm:$0xf0] %v445_v45  ;;  %v361_v50 = vrot.slane %v357_v48, 4  ;;  %v362_v51 = vrot.slane %v358_v49, 4 }
 0x11c   : > { %v329_v52 = vpop.permute.xlu0 %328 }
 0x11d   : > { %v305_v53 = vpop.permute.xlu1 %304  ;;  %365 = vst [vmem:[#allocation3 + $0x10] sm:$0xf0] %v361_v50  ;;  %366 = vst [vmem:[#allocation3 + $0x18] sm:$0xf0] %v362_v51  ;;  %v333_v54 = vsel %vm332_vm11, %v327_v35, %v329_v52  ;;  %v334_v55 = vsel %vm332_vm11, %v329_v52, %v331_v31 }
 0x11e   : > { %v311_v56 = vsel %vm310_vm8, %v305_v53, %v307_v33  ;;  %v337_v57 = vsel %vm267_vm12, %v333_v54, 0.0  ;;  %v338_v58 = vsel %vm268_vm13, %v334_v55, 0.0  ;;  %v472_v16 = vld [vmem:[#allocation3 + $0x8] sm:$0xff] }
 0x11f   : > { %315 = vst [vmem:[#allocation3] sm:$0xf0] %v311_v56  ;;  %339 = vst [vmem:[#allocation3 + $0x10] sm:$0xf] %v337_v57 }
 0x120   : > { %340 = vst [vmem:[#allocation3 + $0x18] sm:$0xf] %v338_v58  ;;  %v393_v59 = vpop.permute.xlu0 %392 }
 0x121   : > { %v419_v60 = vpop.permute.xlu1 %418  ;;  %v397_v61 = vsel %vm396_vm14, %v391_v37, %v393_v59  ;;  %v398_v62 = vsel %vm396_vm14, %v393_v59, %v395_v32 }
 0x122   : > { %v423_v63 = vsel %vm422_vm15, %v417_v36, %v419_v60  ;;  %v424_v0 = vsel %vm422_vm15, %v419_v60, %v421_v28  ;;  %v401_v2 = vsel %vm267_vm12, %v397_v61, 0.0  ;;  %v402_v3 = vsel %vm268_vm13, %v398_v62, 0.0  ;;  %v470_v36 = vld [vmem:[%s1245_s1] sm:$0xf] }
 0x123   : > { %v427_v4 = vsel %vm257_vm6, %v423_v63, 0.0  ;;  %v428_v5 = vsel %vm258_vm7, %v424_v0, 0.0  ;;  %v405_v7 = vrot.slane %v401_v2, 4  ;;  %v406_v8 = vrot.slane %v402_v3, 4  ;;  %v761_v0 = vld [vmem:[%s1248_s4] sm:$0xf] }
 0x124   : > { %429 = vst [vmem:[#allocation3 + $0x30] sm:$0xf] %v427_v4  ;;  %430 = vst [vmem:[#allocation3 + $0x38] sm:$0xf] %v428_v5  ;;  %v373_v9 = vpop.permute.xlu0 %372 }
 0x125   : > { %v375_v10 = vpop.permute.xlu1 %374  ;;  %409 = vst [vmem:[#allocation3 + $0x20] sm:$0xf0] %v405_v7  ;;  %410 = vst [vmem:[#allocation3 + $0x28] sm:$0xf0] %v406_v8 }
 0x126   : > { %v379_v13 = vsel %vm378_vm0, %v373_v9, %v375_v10  ;;  %v380_v14 = vsel %vm378_vm0, %v375_v10, %v1098_v30  ;;  %v471_v15 = vld [vmem:[#allocation3] sm:$0xff]  ;;  %v473_v18 = vld [vmem:[#allocation3 + $0x10] sm:$0xff] }
 0x127   : > { %383 = vst [vmem:[#allocation3 + $0x20] sm:$0xf] %v379_v13  ;;  %384 = vst [vmem:[#allocation3 + $0x28] sm:$0xf] %v380_v14  ;;  %v474_v17 = vld [vmem:[#allocation3 + $0x18] sm:$0xff]  ;;  %v930_v20 = vpack.c.bf16 %v473_v18, %v471_v15 }
 0x128   : > { %v928_v19 = vpack.c.bf16 %v474_v17, %v472_v16  ;;  %v458_v21 = vpop.permute.xlu0 %457 }
 0x129   : > { %v438_v22 = vpop.permute.xlu1 %437 }
 0x12a   : > { %v444_v23 = vsel %vm443_vm9, %v438_v22, %v1100_v39  ;;  %929 = vmatprep.subr.bf16.mxu0 %v928_v19 }
 0x12b   : > { %448 = vst [vmem:[#allocation3 + $0x30] sm:$0xf0] %v444_v23  ;;  %931 = vmatpush1.bf16.msra.mxu0 %v930_v20  ;;  %v478_v29 = vld [vmem:[#allocation3 + $0x38] sm:$0xff] }
 0x12c   : > { %v456_v24 = vpop.permute.xlu0 %455 }
 0x12d   : > { %v460_v25 = vpop.permute.xlu1 %459  ;;  %v462_v26 = vsel %vm1250_vm1, %v456_v24, %v458_v21 }
 0x12e   : > { %v463_v27 = vsel %vm1250_vm1, %v458_v21, %v460_v25  ;;  %v476_v28 = vld [vmem:[#allocation3 + $0x28] sm:$0xff]  ;;  %v466_v30 = vsel %vm267_vm12, %v462_v26, 0.0  ;;  %v475_v33 = vld [vmem:[#allocation3 + $0x20] sm:$0xff]  ;;  %vm487_vm1 = vcmask 293888  }
 0x12f   : > { %v467_v31 = vsel %vm268_vm13, %v463_v27, 0.0  ;;  %v932_v32 = vpack.c.bf16 %v478_v29, %v476_v28  ;;  %468 = vst [vmem:[#allocation3 + $0x40] sm:$0xf] %v466_v30 }
 0x130   : > { %469 = vst [vmem:[#allocation3 + $0x48] sm:$0xf] %v467_v31 }
 0x131   : > { %933 = vmatprep.subr.bf16.mxu0 %v932_v32 }
 0x132   : > { %v477_v34 = vld [vmem:[#allocation3 + $0x30] sm:$0xff] }
 0x133   : > { %v934_v35 = vpack.c.bf16 %v477_v34, %v475_v33 }
 0x135   : > { %935 = vmatpush1.bf16.msra.mxu0 %v934_v35 }
 0x136   : > { %v479_v38 = vld [vmem:[#allocation3 + $0x40] sm:$0xf] }
 0x137   : > { %v480_v37 = vld [vmem:[#allocation3 + $0x48] sm:$0xf] }
 0x138   : > { %918 = vmatprep.subr.msk.mxu0 %vm491_vm2, %v480_v37 }
 0x139   : > { %919 = vmatpush1.msk.msra.mxu0 %vm491_vm2, %v479_v38 }
 0x13a   : > { %920 = vmatmul.mubr.msk.f32.vlgmr.msra.gmra.mrb[0].mxu0 %vm487_vm1, %v470_v36 }
 0x13e   : > { %v485_v39 = vpop.permute.xlu1 %484 }
 0x20d   : > { %v564_v40 = vpop.f32.mrb[0].mxu0 }
 0x20e   : > { %v565_v43 = vadd.f32 %v564_v40, %v485_v39  ;;  %v566_v44 = vpop.f32.mrb[1].mxu0 }
 0x20f   : > { %v567_v45 = vadd.f32 %v566_v44, %v485_v39 }
 0x210   : > { %v569_v46 = vmax.f32 %v565_v43, 0.0 }
 0x211   : > { %v570_v47 = vmax.f32 %v567_v45, 0.0 }
 0x213   : > { %v573_v48 = vcombine.low %v569_v46, %v570_v47 }
 0x215   : > { %574 = vrot.lane.b32.xlu0 %v573_v48, %s982_s24 }
 0x287   : > { %v575_v49 = vpop.permute.xlu0 %574 }
 0x288   : > { %v576_v50 = vrot.slane %v575_v49, 4 }
 0x28a   : > { %v577_v51 = vsel %vm276_vm3, %v576_v50, %v575_v49  ;;  %581 = vst.msk [vmem:[#allocation2 + $0x8] sm:$0xf] %vm284_vm4, %v576_v50  ;;  %vm1253_vm3 = vcmask 769024  }
 0x28b   : > { %580 = vst.msk [vmem:[#allocation2] sm:$0xff] %vm1047_vm5, %v577_v51  ;;  %vm1254_vm4 = vmmov %vm1253_vm3 }
 0x291   : > { %v628_v52 = vld [vmem:[#allocation2 + $0x8] sm:$0xf] }
 0x292   : > { %v609_v53 = vld [vmem:[#allocation2 + $0x8] sm:$0xf]  ;;  %636 = vrot.lane.b32.xlu0 %v628_v52, %s984_s26  ;;  %v627_v54 = vld [vmem:[#allocation2] sm:$0xff] }
 0x293   : > { %617 = vrot.lane.b32.xlu1 %v609_v53, %s986_s28  ;;  %v631_v55 = vcombine.high %v627_v54, %v627_v54  ;;  %v586_v56 = vsel %vm257_vm6, %v627_v54, 0.0  ;;  %v695_v57 = vld [vmem:[#allocation2 + $0x8] sm:$0xf]  ;;  %v594_v62 = vcombine.low %v627_v54, %v627_v54 }
 0x294   : > { %v670_v58 = vld [vmem:[#allocation2 + $0x8] sm:$0xf]  ;;  %588 = vst [vmem:[#allocation3] sm:$0xf] %v586_v56 }
 0x295   : > { %v587_v59 = vsel %vm258_vm7, %v631_v55, 0.0  ;;  %v653_v6 = vld [vmem:[#allocation2 + $0x8] sm:$0xf] }
 0x296   : > { %703 = vrot.lane.b32.xlu0 %v695_v57, %s983_s25  ;;  %589 = vst [vmem:[#allocation3 + $0x8] sm:$0xf] %v587_v59  ;;  %v971_v60 = vld [vmem:[#allocation2 + $0x8] ss:$0 sps:$4 sm:$0xff]  }
 0x297   : > { %678 = vrot.lane.b32.xlu1 %v670_v58, %s987_s29  ;;  %v972_v61 = vld [vmem:[#allocation2 + $0x8] ss:$0 sps:$4 sm:$0xff]  }
 0x298   : > { %v732_v63 = vld [vmem:[#allocation2 + $0x8] sm:$0xf] }
 0x29a   : > { %661 = vrot.lane.b32.xlu0 %v653_v6, %s985_s27 }
 0x29b   : > { %632 = vrot.lane.b32.xlu1 %v627_v54, %s984_s26 }
 0x29e   : > { %598 = vrot.lane.b32.xlu0 %v627_v54, %s988_s30 }
 0x29f   : > { %699 = vrot.lane.b32.xlu1 %v627_v54, %s983_s25 }
 0x2a2   : > { %613 = vrot.lane.b32.xlu0 %v627_v54, %s986_s28 }
 0x2a3   : > { %600 = vrot.lane.b32.xlu1 %v971_v60, %s988_s30 }
 0x2a6   : > { %674 = vrot.lane.b32.xlu0 %v627_v54, %s987_s29 }
 0x2a7   : > { %723 = vrot.lane.b32.xlu1 %v972_v61, %s989_s6 }
 0x2aa   : > { %721 = vrot.lane.b32.xlu0 %v627_v54, %s989_s6 }
 0x2ab   : > { %634 = vrot.lane.b32.xlu1 %v631_v55, %s984_s26 }
 0x2ae   : > { %615 = vrot.lane.b32.xlu0 %v631_v55, %s986_s28 }
 0x2af   : > { %596 = vrot.lane.b32.xlu1 %v594_v62, %s988_s30 }
 0x2b2   : > { %676 = vrot.lane.b32.xlu0 %v631_v55, %s987_s29 }
 0x2b3   : > { %701 = vrot.lane.b32.xlu1 %v631_v55, %s983_s25 }
 0x2b6   : > { %657 = vrot.lane.b32.xlu0 %v627_v54, %s985_s27 }
 0x2b7   : > { %659 = vrot.lane.b32.xlu1 %v631_v55, %s985_s27 }
 0x2ba   : > { %738 = vrot.lane.b32.xlu0 %v631_v55, %s990_s7 }
 0x2bb   : > { %719 = vrot.lane.b32.xlu1 %v594_v62, %s989_s6 }
 0x2be   : > { %736 = vrot.lane.b32.xlu0 %v627_v54, %s990_s7 }
 0x2bf   : > { %740 = vrot.lane.b32.xlu1 %v732_v63, %s990_s7 }
 0x2c3   : > { %764 = vperm.xlu1 %963, %v761_v0  }
 0x304   : > { %v637_v2 = vpop.permute.xlu0 %636 }
 0x305   : > { %v618_v3 = vpop.permute.xlu1 %617 }
 0x308   : > { %v704_v4 = vpop.permute.xlu0 %703 }
 0x309   : > { %v679_v5 = vpop.permute.xlu1 %678 }
 0x30c   : > { %v662_v7 = vpop.permute.xlu0 %661 }
 0x30d   : > { %v633_v8 = vpop.permute.xlu1 %632 }
 0x310   : > { %v599_v10 = vpop.permute.xlu0 %598 }
 0x311   : > { %v700_v9 = vpop.permute.xlu1 %699 }
 0x314   : > { %v614_v14 = vpop.permute.xlu0 %613 }
 0x315   : > { %v601_v13 = vpop.permute.xlu1 %600 }
 0x316   : > { %v603_v15 = vsel %vm310_vm8, %v599_v10, %v601_v13 }
 0x317   : > { %607 = vst [vmem:[#allocation3 + $0x8] sm:$0xf0] %v603_v15 }
 0x318   : > { %v675_v17 = vpop.permute.xlu0 %674 }
 0x319   : > { %v724_v16 = vpop.permute.xlu1 %723 }
 0x31c   : > { %v722_v19 = vpop.permute.xlu0 %721 }
 0x31d   : > { %v635_v18 = vpop.permute.xlu1 %634  ;;  %v726_v22 = vsel %vm443_vm9, %v722_v19, %v724_v16 }
 0x31e   : > { %v638_v20 = vsel %vm352_vm10, %v633_v8, %v635_v18  ;;  %v639_v21 = vsel %vm352_vm10, %v635_v18, %v637_v2  ;;  %730 = vst [vmem:[#allocation3 + $0x38] sm:$0xf0] %v726_v22  ;;  %v752_v11 = vld [vmem:[#allocation3 + $0x8] sm:$0xff] }
 0x31f   : > { %v642_v23 = vsel %vm257_vm6, %v638_v20, 0.0  ;;  %v643_v24 = vsel %vm258_vm7, %v639_v21, 0.0 }
 0x320   : > { %v646_v25 = vrot.slane %v642_v23, 4  ;;  %v647_v26 = vrot.slane %v643_v24, 4  ;;  %v616_v27 = vpop.permute.xlu0 %615 }
 0x321   : > { %v597_v28 = vpop.permute.xlu1 %596  ;;  %v619_v29 = vsel %vm332_vm11, %v614_v14, %v616_v27  ;;  %v620_v30 = vsel %vm332_vm11, %v616_v27, %v618_v3 }
 0x322   : > { %650 = vst [vmem:[#allocation3 + $0x10] sm:$0xf0] %v646_v25  ;;  %651 = vst [vmem:[#allocation3 + $0x18] sm:$0xf0] %v647_v26  ;;  %v602_v31 = vsel %vm310_vm8, %v597_v28, %v599_v10  ;;  %v623_v32 = vsel %vm267_vm12, %v619_v29, 0.0  ;;  %v624_v33 = vsel %vm268_vm13, %v620_v30, 0.0 }
 0x323   : > { %606 = vst [vmem:[#allocation3] sm:$0xf0] %v602_v31  ;;  %625 = vst [vmem:[#allocation3 + $0x10] sm:$0xf] %v623_v32  ;;  %v750_v10 = vld [vmem:[%s1247_s3] sm:$0xf] }
 0x324   : > { %626 = vst [vmem:[#allocation3 + $0x18] sm:$0xf] %v624_v33  ;;  %v677_v34 = vpop.permute.xlu0 %676 }
 0x325   : > { %v702_v35 = vpop.permute.xlu1 %701  ;;  %v680_v36 = vsel %vm396_vm14, %v675_v17, %v677_v34  ;;  %v681_v37 = vsel %vm396_vm14, %v677_v34, %v679_v5 }
 0x326   : > { %v705_v38 = vsel %vm422_vm15, %v700_v9, %v702_v35  ;;  %v706_v39 = vsel %vm422_vm15, %v702_v35, %v704_v4  ;;  %v684_v40 = vsel %vm267_vm12, %v680_v36, 0.0  ;;  %v685_v43 = vsel %vm268_vm13, %v681_v37, 0.0 }
 0x327   : > { %v709_v44 = vsel %vm257_vm6, %v705_v38, 0.0  ;;  %v710_v45 = vsel %vm258_vm7, %v706_v39, 0.0  ;;  %v688_v46 = vrot.slane %v684_v40, 4  ;;  %v689_v47 = vrot.slane %v685_v43, 4 }
 0x328   : > { %711 = vst [vmem:[#allocation3 + $0x30] sm:$0xf] %v709_v44  ;;  %712 = vst [vmem:[#allocation3 + $0x38] sm:$0xf] %v710_v45  ;;  %v658_v48 = vpop.permute.xlu0 %657 }
 0x329   : > { %v660_v49 = vpop.permute.xlu1 %659  ;;  %692 = vst [vmem:[#allocation3 + $0x20] sm:$0xf0] %v688_v46  ;;  %693 = vst [vmem:[#allocation3 + $0x28] sm:$0xf0] %v689_v47 }
 0x32a   : > { %v663_v50 = vsel %vm378_vm0, %v658_v48, %v660_v49  ;;  %v664_v51 = vsel %vm378_vm0, %v660_v49, %v662_v7  ;;  %v751_v52 = vld [vmem:[#allocation3] sm:$0xff]  ;;  %v753_v54 = vld [vmem:[#allocation3 + $0x10] sm:$0xff] }
 0x32b   : > { %667 = vst [vmem:[#allocation3 + $0x20] sm:$0xf] %v663_v50  ;;  %668 = vst [vmem:[#allocation3 + $0x28] sm:$0xf] %v664_v51  ;;  %v754_v53 = vld [vmem:[#allocation3 + $0x18] sm:$0xff]  ;;  %v938_v55 = vpack.c.bf16 %v753_v54, %v751_v52 }
 0x32c   : > { %v936_v12 = vpack.c.bf16 %v754_v53, %v752_v11  ;;  %v739_v56 = vpop.permute.xlu0 %738 }
 0x32d   : > { %v720_v57 = vpop.permute.xlu1 %719 }
 0x32e   : > { %v725_v58 = vsel %vm443_vm9, %v720_v57, %v722_v19  ;;  %937 = vmatprep.subr.bf16.mxu1 %v936_v12 }
 0x32f   : > { %729 = vst [vmem:[#allocation3 + $0x30] sm:$0xf0] %v725_v58  ;;  %939 = vmatpush1.bf16.msra.mxu1 %v938_v55  ;;  %v758_v63 = vld [vmem:[#allocation3 + $0x38] sm:$0xff] }
 0x330   : > { %v737_v59 = vpop.permute.xlu0 %736 }
 0x331   : > { %v741_v6 = vpop.permute.xlu1 %740  ;;  %v742_v60 = vsel %vm1253_vm3, %v737_v59, %v739_v56 }
 0x332   : > { %v743_v61 = vsel %vm1254_vm4, %v739_v56, %v741_v6  ;;  %v756_v62 = vld [vmem:[#allocation3 + $0x28] sm:$0xff]  ;;  %v746_v0 = vsel %vm267_vm12, %v742_v60, 0.0  ;;  %v755_v4 = vld [vmem:[#allocation3 + $0x20] sm:$0xff] }
 0x333   : > { %v747_v2 = vsel %vm268_vm13, %v743_v61, 0.0  ;;  %v940_v3 = vpack.c.bf16 %v758_v63, %v756_v62  ;;  %748 = vst [vmem:[#allocation3 + $0x40] sm:$0xf] %v746_v0 }
 0x334   : > { %749 = vst [vmem:[#allocation3 + $0x48] sm:$0xf] %v747_v2 }
 0x335   : > { %941 = vmatprep.subr.bf16.mxu1 %v940_v3 }
 0x336   : > { %v757_v5 = vld [vmem:[#allocation3 + $0x30] sm:$0xff] }
 0x337   : > { %v942_v7 = vpack.c.bf16 %v757_v5, %v755_v4 }
 0x339   : > { %943 = vmatpush1.bf16.msra.mxu1 %v942_v7 }
 0x33a   : > { %v759_v9 = vld [vmem:[#allocation3 + $0x40] sm:$0xf] }
 0x33b   : > { %v760_v8 = vld [vmem:[#allocation3 + $0x48] sm:$0xf] }
 0x33c   : > { %921 = vmatprep.subr.msk.mxu1 %vm491_vm2, %v760_v8 }
 0x33d   : > { %922 = vmatpush1.msk.msra.mxu1 %vm491_vm2, %v759_v9 }
 0x33e   : > { %923 = vmatmul.mubr.msk.f32.vlgmr.msra.gmra.mrb[0].mxu1 %vm487_vm1, %v750_v10 }
 0x342   : > { %v765_v41 = vpop.permute.xlu1 %764 }
 0x411   : > { %v842_v42 = vpop.f32.mrb[0].mxu1 }
 0x412   : > { %v843_v13 = vadd.f32 %v842_v42, %v765_v41  ;;  %v844_v14 = vpop.f32.mrb[1].mxu1 }
 0x413   : > { %v845_v15 = vadd.f32 %v844_v14, %v765_v41 }
 0x415   : > { %v849_v16 = vcombine.low %v843_v13, %v845_v15 }
 0x417   : > { %v851_v17 = vadd.f32 %v849_v16, %v1038_v1 }
 0x419   : > { %v852_v18 = vmax.f32 %v851_v17, 0.0 }
 0x41b   : > { %853 = vst [vmem:[%s224_s21] sm:$0xff] %v852_v18 }
 0x41c PF: > { %s15_s18 = sadd.s32 1, %s979_s18  }
 0x41d   : > { %p12_p4 = scmp.ge.s32.totalorder %s15_s18, 4  }
 0x41f   :  { %14 = sbr.rel (!%p12_p4) target bundleno = 1 (0x1), region = 70 }

</bundles_post_ra>
